<compile_context>
chip_gen: v7x
topology: tpu7x:2x2x1
jax: 0.10.0
libtpu: 0.0.40
codegen_flags: <defaults>
</compile_context>

<pallas_src>
import math

import jax
import jax.numpy as jnp
from jax.experimental import pallas as pl
from jax.experimental.pallas import tpu as pltpu

LOG2 = math.log(2.0)


def _ssp_kernel(params_ref, x_ref, o_ref):
    # params (SMEM, f32[4]): [beta, c1 = alpha/beta, c2 = -alpha*log2/beta, 0.5*alpha]
    beta = params_ref[0]
    c1 = params_ref[1]
    c2 = params_ref[2]
    half_alpha = params_ref[3]

    @pl.when(beta != 0.0)
    def _softplus_path():
        x = x_ref[...].astype(jnp.float32)
        z = beta * x
        # numerically stable softplus: log(1+exp(z)) = max(z,0) + log1p(exp(-|z|))
        sp = jnp.maximum(z, 0.0) + jnp.log1p(jnp.exp(-jnp.abs(z)))
        o_ref[...] = (c1 * sp + c2).astype(o_ref.dtype)

    @pl.when(beta == 0.0)
    def _linear_path():
        x = x_ref[...].astype(jnp.float32)
        o_ref[...] = (half_alpha * x).astype(o_ref.dtype)


def shifted_softplus(x, alpha, beta, *, lanes=1024, max_block_rows=512):
    """Elementwise shifted softplus.

    x: float array of any shape (the module uses [:, num_features]).
    alpha, beta: python floats, 0-d arrays, or shape-(1,) arrays.
    """
    orig_shape = x.shape
    orig_dtype = x.dtype
    total = x.size

    if total == 0:
        return x

    # --- host-side scalar precompute (hoists the division / branch) ---------
    alpha_f = jnp.asarray(alpha, jnp.float32).reshape(())
    beta_f = jnp.asarray(beta, jnp.float32).reshape(())
    safe_beta = jnp.where(beta_f != 0.0, beta_f, 1.0)
    c1 = alpha_f / safe_beta
    c2 = -alpha_f * LOG2 / safe_beta
    half_alpha = 0.5 * alpha_f
    params = jnp.stack([beta_f, c1, c2, half_alpha]).astype(jnp.float32)  # (4,)

    # --- flatten + pad to a lane-dense slab ---------------------------------
    flat = x.reshape(-1)
    rows = pl.cdiv(total, lanes)                  # static python int
    block_rows = min(max_block_rows, rows)        # full slab if small
    padded_rows = pl.cdiv(rows, block_rows) * block_rows
    padded_total = padded_rows * lanes
    if padded_total != total:
        flat = jnp.pad(flat, (0, padded_total - total))
    slab = flat.reshape(padded_rows, lanes)

    grid = (padded_rows // block_rows,)

    out_slab = pl.pallas_call(
        _ssp_kernel,
        out_shape=jax.ShapeDtypeStruct((padded_rows, lanes), orig_dtype),
        grid=grid,
        in_specs=[
            pl.BlockSpec(memory_space=pltpu.MemorySpace.SMEM),     # params
            pl.BlockSpec((block_rows, lanes), lambda i: (i, 0)),   # x tile
        ],
        out_specs=pl.BlockSpec((block_rows, lanes), lambda i: (i, 0)),
        compiler_params=pltpu.CompilerParams(
            dimension_semantics=("parallel",),
        ),
    )(params, slab)

    return out_slab.reshape(-1)[:total].reshape(orig_shape)


def _reference(x, alpha, beta):
    x = x.astype(jnp.float32)
    alpha = jnp.asarray(alpha, jnp.float32)
    beta = jnp.asarray(beta, jnp.float32)
    z = beta * x
    sp = jnp.maximum(z, 0.0) + jnp.log1p(jnp.exp(-jnp.abs(z)))
    safe_beta = jnp.where(beta != 0.0, beta, 1.0)
    y = jnp.where(beta != 0.0, (sp - LOG2) / safe_beta, 0.5 * x)
    return (alpha * y).astype(x.dtype)


if __name__ == "__main__":
    key = jax.random.PRNGKey(0)
    # module forward expects FloatTensor [:, num_features]
    N, F = 8, 32
    x = jax.random.normal(key, (N, F), dtype=jnp.float32)

    # module defaults: alpha = 1.0, beta = 1.0
    y = jax.block_until_ready(shifted_softplus(x, 1.0, 1.0))
    y_ref = _reference(x, 1.0, 1.0)
    assert y.shape == x.shape and y.dtype == x.dtype
    assert jnp.allclose(y, y_ref, atol=1e-5, rtol=1e-5), "mismatch vs reference"

    # beta == 0 branch: alpha=2, beta=0  ->  identity
    y0 = jax.block_until_ready(shifted_softplus(x, 2.0, 0.0))
    assert jnp.allclose(y0, x, atol=1e-5, rtol=1e-5), "beta==0 branch mismatch"

    # a second small case with a non-trivial pad remainder and different params
    x2 = jax.random.normal(jax.random.PRNGKey(1), (16, 48), dtype=jnp.float32)
    y2 = jax.block_until_ready(shifted_softplus(x2, 1.5, 2.5))
    assert jnp.allclose(y2, _reference(x2, 1.5, 2.5), atol=1e-5, rtol=1e-5)

    print("KERNEL_OK")
</pallas_src>

<mosaic_0001>
module attributes {stable_mosaic.version = 11 : i64} {
  func.func @_ssp_kernel(%arg0: i32, %arg1: memref<4xf32, #tpu.memory_space<smem>>, %arg2: memref<1x1024xf32, #tpu.memory_space<vmem>>, %arg3: memref<1x1024xf32, #tpu.memory_space<vmem>>) attributes {dimension_semantics = [#tpu.dimension_semantics<parallel>], iteration_bounds = array<i64: 1>, scalar_prefetch = 0 : i64, scratch_operands = 0 : i64, tpu.core_type = #tpu.core_type<tc>, window_params = [{transform_indices = @transform_0, window_bounds = array<i64: 4>}, {transform_indices = @transform_1, window_bounds = array<i64: 1, 1024>}, {transform_indices = @transform_2, window_bounds = array<i64: 1, 1024>}]} {
    %c0 = arith.constant 0 : index
    %0 = memref.load %arg1[%c0] : memref<4xf32, #tpu.memory_space<smem>>
    %c1 = arith.constant 1 : index
    %1 = memref.load %arg1[%c1] : memref<4xf32, #tpu.memory_space<smem>>
    %c2 = arith.constant 2 : index
    %2 = memref.load %arg1[%c2] : memref<4xf32, #tpu.memory_space<smem>>
    %c3 = arith.constant 3 : index
    %3 = memref.load %arg1[%c3] : memref<4xf32, #tpu.memory_space<smem>>
    %cst = arith.constant 0.000000e+00 : f32
    %4 = arith.cmpf one, %0, %cst : f32
    %5 = arith.extui %4 : i1 to i32
    %c0_i32 = arith.constant 0 : i32
    %6 = arith.cmpi ne, %5, %c0_i32 : i32
    scf.if %6 {
      %c0_2 = arith.constant 0 : index
      %c0_3 = arith.constant 0 : index
      %10 = vector.load %arg2[%c0_2, %c0_3] : memref<1x1024xf32, #tpu.memory_space<vmem>>, vector<1x1024xf32>
      %11 = vector.broadcast %0 : f32 to vector<1x1024xf32>
      %12 = arith.mulf %11, %10 : vector<1x1024xf32>
      %cst_4 = arith.constant 0.000000e+00 : f32
      %13 = vector.broadcast %cst_4 : f32 to vector<1x1024xf32>
      %14 = arith.maximumf %12, %13 : vector<1x1024xf32>
      %15 = math.absf %12 : vector<1x1024xf32>
      %cst_5 = arith.constant 0.000000e+00 : f32
      %16 = vector.broadcast %cst_5 : f32 to vector<1x1024xf32>
      %17 = arith.subf %16, %15 : vector<1x1024xf32>
      %18 = math.exp %17 : vector<1x1024xf32>
      %19 = math.log1p %18 : vector<1x1024xf32>
      %20 = arith.addf %14, %19 : vector<1x1024xf32>
      %21 = vector.broadcast %1 : f32 to vector<1x1024xf32>
      %22 = arith.mulf %21, %20 : vector<1x1024xf32>
      %23 = vector.broadcast %2 : f32 to vector<1x1024xf32>
      %24 = arith.addf %22, %23 : vector<1x1024xf32>
      %c0_6 = arith.constant 0 : index
      %c0_7 = arith.constant 0 : index
      %25 = vector.load %arg3[%c0_6, %c0_7] : memref<1x1024xf32, #tpu.memory_space<vmem>>, vector<1x1024xf32>
      tpu.vector_store %arg3[%c0_6, %c0_7], %24 {strides = array<i32>} : memref<1x1024xf32, #tpu.memory_space<vmem>>, vector<1x1024xf32>,
    } else {
    }
    %cst_0 = arith.constant 0.000000e+00 : f32
    %7 = arith.cmpf oeq, %0, %cst_0 : f32
    %8 = arith.extui %7 : i1 to i32
    %c0_i32_1 = arith.constant 0 : i32
    %9 = arith.cmpi ne, %8, %c0_i32_1 : i32
    scf.if %9 {
      %c0_2 = arith.constant 0 : index
      %c0_3 = arith.constant 0 : index
      %10 = vector.load %arg2[%c0_2, %c0_3] : memref<1x1024xf32, #tpu.memory_space<vmem>>, vector<1x1024xf32>
      %11 = vector.broadcast %3 : f32 to vector<1x1024xf32>
      %12 = arith.mulf %11, %10 : vector<1x1024xf32>
      %c0_4 = arith.constant 0 : index
      %c0_5 = arith.constant 0 : index
      %13 = vector.load %arg3[%c0_4, %c0_5] : memref<1x1024xf32, #tpu.memory_space<vmem>>, vector<1x1024xf32>
      tpu.vector_store %arg3[%c0_4, %c0_5], %12 {strides = array<i32>} : memref<1x1024xf32, #tpu.memory_space<vmem>>, vector<1x1024xf32>,
    } else {
    }
    return
  }
  func.func @transform_0(%arg0: i32) -> i32 {
    %c0_i32 = arith.constant 0 : i32
    %c0_i32_0 = arith.constant 0 : i32
    return %c0_i32 : i32
  }
  func.func @transform_1(%arg0: i32) -> (i32, i32) {
    %c0_i32 = arith.constant 0 : i32
    %c0_i32_0 = arith.constant 0 : i32
    return %arg0, %c0_i32 : i32, i32
  }
  func.func @transform_2(%arg0: i32) -> (i32, i32) {
    %c0_i32 = arith.constant 0 : i32
    %c0_i32_0 = arith.constant 0 : i32
    return %arg0, %c0_i32 : i32, i32
  }
}

</mosaic_0001>

<bundles_post_ra>
// kernel: tpu_custom_call.1
= control target key start
LH: loop header
LB: loop body
LE: loop exit
PB: predicated region body
PF: predicated region fallthrough
CT: control target
= control target key end

     0   :  { %7 = vsyncpa [#allocation5], 0  ;;  %s222_s0 = inlined_call_operand.hbm [shape: f32[4], index: 0, kind: input, shape index: {}]   ;;  %s223_s1 = inlined_call_operand.hbm [shape: f32[1,1024], index: 1, kind: input, shape index: {}]   ;;  %s224_s2 = inlined_call_operand.hbm [shape: f32[1,1024], index: 2, kind: output, shape index: {}]  }
   0x1   :  { %8 = vsyncpa [#allocation3], 0 }
   0x2   :  { %9 = vsyncpa [#allocation4], 0  ;;  %s100_s11 = scalar_lea.hbm %s222_s0, 16 }
   0x3   :  { %p101_p0 = scmp.ne.s32.totalorder %s222_s0, %s100_s11  ;;  %p104_p1 = scmp.lt.u32.totalorder %s100_s11, %s222_s0 }
   0x5   :  { %p106_p2 = pnand %p104_p1, %p101_p0 }
   0x7   :  { %109 = shalt.err (!%p106_p2)
}
   0x8   :  { %s160_s16 = smov [#allocation2]   ;;  %s161_s19 = smov [#allocation6]  }
   0x9   :  { %17 = dma.hbm_to_smem %s222_s0, 16, %s160_s16, [#allocation5]  }
   0xa   :  { %s24_s20 = sshll.u32 %s161_s19, 4  ;;  %s110_s23 = scalar_lea.hbm %s223_s1, 128  ;;  %s25_s20 = int_to_ptr.vmem [resolvable:$true] %s24_s20 }
   0xb   :  { %p111_p3 = scmp.ne.s32.totalorder %s223_s1, %s110_s23  ;;  %p114_p4 = scmp.lt.u32.totalorder %s110_s23, %s223_s1 }
   0xd   :  { %p116_p5 = pnand %p114_p4, %p111_p3 }
   0xf   :  { %119 = shalt.err (!%p116_p5)
}
  0x10   :  { %s120_s28 = scalar_lea.vmem %s25_s20, 128  ;;  %p125_p7 = scmp.lt.s32.totalorder %s25_s20, %s25_s20 }
  0x11   :  { %p121_p6 = scmp.ne.s32.totalorder %s25_s20, %s120_s28  ;;  %p126_p8 = scmp.lt.s32.totalorder %s120_s28, %s120_s28 }
  0x13   :  { %p127_p9 = por %p126_p8, %p125_p7 }
  0x15   :  { %p128_p10 = pnand %p127_p9, %p121_p6 }
  0x17   :  { %131 = shalt.err (!%p128_p10)
}
  0x18   :  { %27 = dma.hbm_to_vmem [thread:$0]  %s223_s1, 128, %s25_s20, [#allocation3]  }
  0x19   :  { %154 = dma.done.wait [#allocation5], 16  }
  0x1a   :  { %155 = vsyncadd [#allocation5], 4294967280 }
  0x1b   :  { %156 = dma.done.wait [#allocation3], 128  }
  0x1c   :  { %157 = vsyncadd [#allocation3], 4294967168 }
  0x1d   :  { %34 = sfence }
  0x1e   :  { %s202_s30 = sld [smem:[#allocation2]]  ;;  %s90_s3 = sld [smem:[#allocation2 + $0x1]] }
  0x1f   :  { %s91_s4 = sld [smem:[#allocation2 + $0x2]]  ;;  %s204_s5 = sld [smem:[#allocation2 + $0x3]] }
  0x24   :  { %p39_p11 = scmp.ne.f32.partialorder %s202_s30, 0.0 }
  0x25   :  { %v43_v0 = vld [vmem:[#allocation6] sm:$0xff] (%p39_p11)  ;;  %v44_v1 = vstv (%p39_p11), %s202_s30  ;;  %v61_v16 = vstv (%p39_p11), %s90_s3  ;;  %v63_v18 = vstv (%p39_p11), %s91_s4 }
  0x26   :  { %42 = sbr.rel (!%p39_p11) target bundleno = 80 (0x50), region = 21  ;;  %v45_v2 = vmul.f32 (%p39_p11), %v44_v1, %v43_v0 }
  0x28   :  { %v47_v3 = vand.u32 (%p39_p11), 2147483647, %v45_v2  ;;  %v46_v13 = vmax.f32 (%p39_p11), %v45_v2, 0.0 }
  0x2a   :  { %v48_v4 = vsub.f32 (%p39_p11), 0.0, %v47_v3 }
  0x2c   :  { %v49_v5 = vmul.f32 (%p39_p11), 1.442695, %v48_v4 }
  0x2e   :  { %96 = vpow2.f32 %v49_v5 }
  0x38   :  { %v97_v6 = vpop.eup %96 }
  0x39   :  { %v51_v7 = vadd.f32 1.0, %v97_v6  ;;  %v54_v8 = vmul.f32 -0.5, %v97_v6  ;;  %v57_v10 = vand.u32 2147483647, %v97_v6 }
  0x3b   :  { %98 = vlog2.f32 %v51_v7  ;;  %v55_v9 = vadd.f32 1.0, %v54_v8  ;;  %vm58_vm0 = vcmp.lt.f32.partialorder %v57_v10, 0.0004427343 }
  0x3d   :  { %v56_v11 = vmul.f32 %v97_v6, %v55_v9 }
  0x45   :  { %v99_v12 = vpop.eup %98 }
  0x46   :  { %v53_v14 = vmul.f32 0.6931472, %v99_v12 }
  0x48   :  { %v59_v15 = vsel %vm58_vm0, %v56_v11, %v53_v14 }
  0x49   :  { %v60_v17 = vadd.f32 %v59_v15, %v46_v13 }
  0x4b   :  { %v62_v19 = vmul.f32 %v61_v16, %v60_v17 }
  0x4d   :  { %v64_v20 = vadd.f32 %v63_v18, %v62_v19 }
  0x4f   :  { %65 = vst [vmem:[#allocation7] sm:$0xff] %v64_v20 }
  0x50 PF:  { %p66_p12 = scmp.eq.f32.partialorder %s202_s30, 0.0 }
  0x51   :  { %v70_v21 = vld [vmem:[#allocation6] sm:$0xff] (%p66_p12)  ;;  %v71_v22 = vstv (%p66_p12), %s204_s5 }
  0x52   :  { %69 = sbr.rel (!%p66_p12) target bundleno = 89 (0x59), region = 25  ;;  %v72_v23 = vmul.f32 (%p66_p12), %v71_v22, %v70_v21 }
  0x54   :  { %73 = vst [vmem:[#allocation7] sm:$0xff] (%p66_p12), %v72_v23 }
  0x59 PF:  { %s162_s1 = smov [#allocation7]  }
  0x5a   :  { %s80_s6 = sshll.u32 %s162_s1, 4  ;;  %s81_s6 = int_to_ptr.vmem [resolvable:$true] %s80_s6 }
  0x5b   :  { %s132_s7 = scalar_lea.vmem %s81_s6, 128  ;;  %p137_p0 = scmp.lt.s32.totalorder %s81_s6, %s81_s6 }
  0x5c   :  { %p133_p13 = scmp.ne.s32.totalorder %s81_s6, %s132_s7  ;;  %p138_p1 = scmp.lt.s32.totalorder %s132_s7, %s132_s7 }
  0x5e   :  { %p139_p2 = por %p138_p1, %p137_p0 }
  0x60   :  { %p140_p3 = pnand %p139_p2, %p133_p13 }
  0x62   :  { %143 = shalt.err (!%p140_p3)
}
  0x63   :  { %s144_s10 = scalar_lea.hbm %s224_s2, 128 }
  0x64   :  { %p145_p4 = scmp.ne.s32.totalorder %s224_s2, %s144_s10  ;;  %p148_p5 = scmp.lt.u32.totalorder %s144_s10, %s224_s2 }
  0x66   :  { %p150_p6 = pnand %p148_p5, %p145_p4 }
  0x68   :  { %153 = shalt.err (!%p150_p6)
}
  0x69   :  { %83 = dma.vmem_to_hbm [thread:$0]  %s81_s6, 128, %s224_s2, [#allocation4]  }
  0x6a   :  { %158 = dma.done.wait [#allocation4], 128  }
  0x6b   :  { %159 = vsyncadd [#allocation4], 4294967168 }
  0x6c   :  { %87 = vsyncpa [#allocation3], 1 }
  0x6d   :  { %88 = vsyncpa [#allocation4], 1 }
  0x6e   :  { %89 = vsyncpa [#allocation5], 1 }

</bundles_post_ra>
